<compile_context>
chip_gen: v5e
topology: v5e:2x2
jax: 0.10.0
libtpu: 0.0.40
codegen_flags: <defaults>
</compile_context>

<pallas_src>
import functools
import math

import jax
import jax.numpy as jnp
from jax.experimental import pallas as pl
from jax.experimental.pallas import tpu as pltpu


# ---------------------------------------------------------------------------
# Buffer setup (plain JAX; mirrors positional_encoding() in the PyTorch module)
# ---------------------------------------------------------------------------
def positional_encoding_table(max_len: int, d_model: int, c1: float = 10000.0):
    """Returns pe of shape (max_len, d_model), float32."""
    pos = jnp.arange(max_len, dtype=jnp.float32)[:, None]            # (L, 1)
    i = jnp.arange(d_model, dtype=jnp.int32)                         # (D,)
    angle_rates = 1.0 / jnp.power(
        jnp.float32(c1),
        2.0 * (i // 2).astype(jnp.float32) / jnp.float32(d_model),
    )                                                                 # (D,)
    angles = pos * angle_rates                                        # (L, D)
    pe = jnp.where((i % 2) == 0, jnp.sin(angles), jnp.cos(angles))
    return pe.astype(jnp.float32)


# ---------------------------------------------------------------------------
# Layout helpers: fold (S, D) -> (M, L) with a lane-dense L, tile M.
# ---------------------------------------------------------------------------
def _fold_last_dims(S: int, D: int):
    total = S * D
    for L in (1024, 896, 768, 640, 512, 384, 256, 128):
        if total % L == 0:
            return total // L, L
    # Fallback: keep the natural layout (block == full extent stays legal).
    return S, D


def _choose_sublane_tile(M: int, L: int, dtype_bytes: int = 4,
                         target_bytes: int = 1 << 20):
    """Largest multiple-of-8 divisor of M with tile bytes <= ~target."""
    if M <= 8:
        return M
    cap = max(8, target_bytes // max(1, L * dtype_bytes))
    cap = min(cap, M)
    tm = (cap // 8) * 8
    while tm >= 8:
        if M % tm == 0:
            return tm
        tm -= 8
    return M  # fallback: full extent (always a legal block)


# ---------------------------------------------------------------------------
# Pallas kernels
# ---------------------------------------------------------------------------
def _pe_eval_kernel(x_ref, pe_ref, o_ref, *, scale):
    # x_ref: (1, TM, L)  pe_ref: (TM, L)  o_ref: (1, TM, L)
    y = x_ref[0].astype(jnp.float32) * jnp.float32(scale) \
        + pe_ref[...].astype(jnp.float32)
    o_ref[0] = y.astype(o_ref.dtype)


def _pe_dropout_kernel(x_ref, pe_ref, bits_ref, o_ref, *,
                       scale, threshold, inv_keep):
    y = x_ref[0].astype(jnp.float32) * jnp.float32(scale) \
        + pe_ref[...].astype(jnp.float32)
    # Inverted dropout: keep iff uniform uint32 >= p * 2^32  (P(keep) = 1 - p).
    keep = bits_ref[0] >= jnp.uint32(threshold)
    y = jnp.where(keep, y * jnp.float32(inv_keep), jnp.float32(0.0))
    o_ref[0] = y.astype(o_ref.dtype)


# ---------------------------------------------------------------------------
# Module wrapper
# ---------------------------------------------------------------------------
class PositionalEncoding:
    """Pallas port of gxbert PositionalEncoding."""

    def __init__(self, d_model, dropout=0.1, max_len=1000, c1=10000.0):
        self.d_model = d_model
        self.dropout_p = float(dropout)
        self.pe = positional_encoding_table(max_len, d_model, c1)  # (max_len, D)

    def __call__(self, x, *, training=False, rng=None):
        B, S, D = x.shape
        assert D == self.d_model

        M, L = _fold_last_dims(S, D)
        TM = _choose_sublane_tile(M, L, dtype_bytes=4)

        x3 = x.reshape(B, M, L)                                     # free reshape
        pe2 = self.pe[:S, :].astype(x.dtype).reshape(M, L)

        grid = (M // TM, B)                                         # pe tile outer, batch inner
        x_spec = pl.BlockSpec((1, TM, L), lambda m, b: (b, m, 0))
        pe_spec = pl.BlockSpec((TM, L), lambda m, b: (m, 0))        # constant over inner b loop
        out_spec = pl.BlockSpec((1, TM, L), lambda m, b: (b, m, 0))

        scale = math.sqrt(float(self.d_model))
        use_dropout = training and self.dropout_p > 0.0

        if use_dropout:
            if rng is None:
                rng = jax.random.PRNGKey(0)
            bits = jax.random.bits(rng, (B, M, L), dtype=jnp.uint32)
            threshold = min(int(round(self.dropout_p * 2.0 ** 32)), 2 ** 32 - 1)
            inv_keep = 1.0 / (1.0 - self.dropout_p)
            kernel = functools.partial(
                _pe_dropout_kernel, scale=scale,
                threshold=threshold, inv_keep=inv_keep)
            in_specs = [x_spec, pe_spec,
                        pl.BlockSpec((1, TM, L), lambda m, b: (b, m, 0))]
            args = (x3, pe2, bits)
        else:
            kernel = functools.partial(_pe_eval_kernel, scale=scale)
            in_specs = [x_spec, pe_spec]
            args = (x3, pe2)

        out = pl.pallas_call(
            kernel,
            out_shape=jax.ShapeDtypeStruct((B, M, L), x.dtype),
            grid=grid,
            in_specs=in_specs,
            out_specs=out_spec,
            compiler_params=pltpu.CompilerParams(
                dimension_semantics=("parallel", "parallel"),
            ),
        )(*args)

        return out.reshape(B, S, D)


# ---------------------------------------------------------------------------
# Pure-JAX reference (eval mode / no dropout)
# ---------------------------------------------------------------------------
def _reference(x, pe, d_model):
    S = x.shape[1]
    return x * jnp.sqrt(jnp.float32(d_model)) + pe[None, :S, :]


if __name__ == "__main__":
    B, S, D = 2, 8, 32
    key = jax.random.PRNGKey(0)
    kx, kd = jax.random.split(key)
    x = jax.random.normal(kx, (B, S, D), dtype=jnp.float32)

    module = PositionalEncoding(d_model=D, dropout=0.1, max_len=1000)

    # Eval-mode forward (dropout is identity) -> deterministic, checkable.
    out = jax.block_until_ready(module(x, training=False))
    ref = _reference(x, module.pe, D)
    assert out.shape == (B, S, D)
    assert jnp.allclose(out, ref, atol=1e-5, rtol=1e-5)

    # Training-mode forward: kept entries must equal ref / (1 - p), rest zero.
    out_train = jax.block_until_ready(module(x, training=True, rng=kd))
    assert out_train.shape == (B, S, D)
    inv_keep = 1.0 / (1.0 - module.dropout_p)
    keep_mask = out_train != 0.0
    assert jnp.allclose(out_train,
                        jnp.where(keep_mask, ref * inv_keep, 0.0),
                        atol=1e-4, rtol=1e-4)

    print("KERNEL_OK")
</pallas_src>

<mosaic_0001>
module attributes {stable_mosaic.version = 11 : i64} {
  func.func @_pe_eval_kernel(%arg0: i32, %arg1: i32, %arg2: memref<1x1x256xf32, #tpu.memory_space<vmem>>, %arg3: memref<1x256xf32, #tpu.memory_space<vmem>>, %arg4: memref<1x1x256xf32, #tpu.memory_space<vmem>>) attributes {dimension_semantics = [#tpu.dimension_semantics<parallel>, #tpu.dimension_semantics<parallel>], iteration_bounds = array<i64: 1, 2>, scalar_prefetch = 0 : i64, scratch_operands = 0 : i64, tpu.core_type = #tpu.core_type<tc>, window_params = [{transform_indices = @transform_0, window_bounds = array<i64: 1, 1, 256>}, {transform_indices = @transform_1, window_bounds = array<i64: 1, 256>}, {transform_indices = @transform_2, window_bounds = array<i64: 1, 1, 256>}]} {
    %c0 = arith.constant 0 : index
    %c0_0 = arith.constant 0 : index
    %c0_1 = arith.constant 0 : index
    %0 = vector.load %arg2[%c0, %c0_0, %c0_1] : memref<1x1x256xf32, #tpu.memory_space<vmem>>, vector<1x1x256xf32>
    %1 = vector.shape_cast %0 : vector<1x1x256xf32> to vector<1x256xf32>
    %cst = arith.constant 5.65685415 : f32
    %2 = vector.broadcast %cst : f32 to vector<1x256xf32>
    %3 = arith.mulf %1, %2 : vector<1x256xf32>
    %c0_2 = arith.constant 0 : index
    %c0_3 = arith.constant 0 : index
    %4 = vector.load %arg3[%c0_2, %c0_3] : memref<1x256xf32, #tpu.memory_space<vmem>>, vector<1x256xf32>
    %5 = arith.addf %3, %4 : vector<1x256xf32>
    %c0_4 = arith.constant 0 : index
    %c0_5 = arith.constant 0 : index
    %c0_6 = arith.constant 0 : index
    %6 = vector.load %arg4[%c0_4, %c0_5, %c0_6] : memref<1x1x256xf32, #tpu.memory_space<vmem>>, vector<1x1x256xf32>
    %7 = vector.shape_cast %6 : vector<1x1x256xf32> to vector<1x256xf32>
    %8 = vector.shape_cast %5 : vector<1x256xf32> to vector<1x1x256xf32>
    tpu.vector_store %arg4[%c0_4, %c0_5, %c0_6], %8 {strides = array<i32>} : memref<1x1x256xf32, #tpu.memory_space<vmem>>, vector<1x1x256xf32>,
    return
  }
  func.func @transform_0(%arg0: i32, %arg1: i32) -> (i32, i32, i32) {
    %c0_i32 = arith.constant 0 : i32
    %c0_i32_0 = arith.constant 0 : i32
    return %arg1, %arg0, %c0_i32 : i32, i32, i32
  }
  func.func @transform_1(%arg0: i32, %arg1: i32) -> (i32, i32) {
    %c0_i32 = arith.constant 0 : i32
    %c0_i32_0 = arith.constant 0 : i32
    return %arg0, %c0_i32 : i32, i32
  }
  func.func @transform_2(%arg0: i32, %arg1: i32) -> (i32, i32, i32) {
    %c0_i32 = arith.constant 0 : i32
    %c0_i32_0 = arith.constant 0 : i32
    return %arg1, %arg0, %c0_i32 : i32, i32, i32
  }
}

</mosaic_0001>

<bundles_post_ra>
// kernel: tpu_custom_call.1
= control target key start
LH: loop header
LB: loop body
LE: loop exit
PB: predicated region body
PF: predicated region fallthrough
CT: control target
= control target key end

     0   :  { %7 = vsyncpa [#allocation3], 0  ;;  %s723_s0 = inlined_call_operand.hbm [shape: f32[2,1,256], index: 0, kind: input, shape index: {}]   ;;  %s724_s1 = inlined_call_operand.hbm [shape: f32[1,256], index: 1, kind: input, shape index: {}]   ;;  %s725_s2 = inlined_call_operand.hbm [shape: f32[2,1,256], index: 2, kind: output, shape index: {}]  }
   0x1   :  { %9 = vsyncpa [#allocation3 + $0x1], 0 }
   0x2   :  { %10 = vsyncpa [#allocation6], 0 }
   0x3   :  { %11 = vsyncpa [#allocation4], 0 }
   0x4   :  { %13 = vsyncpa [#allocation4 + $0x1], 0  ;;  %s574_s9 = smov 0   ;;  %s576_s10 = smov 0  }
   0x5   :  { %s578_s11 = smov 0   ;;  %s580_s12 = smov 0  }
   0x6   :  { %s582_s13 = smov 0   ;;  %s584_s14 = smov 0  }
   0x7 LB: > { %s322_s15 = sadd.s32 4294967295, %s556_s14   ;;  %s323_s16 = sadd.s32 4294967294, %s556_s14   ;;  %s556_s14 = sphi %s584_s14, %s19_s14   ;;  %s552_s13 = sphi %s582_s13, %s737_s13   ;;  %s548_s12 = sphi %s580_s12, %s736_s12   ;;  %s544_s11 = sphi %s578_s11, %s735_s11   ;;  %s540_s10 = sphi %s576_s10, %s734_s10   ;;  %s536_s9 = sphi %s574_s9, %s733_s9  }
   0x8   : > { %p53_p0 = scmp.ne.s32.totalorder %s540_s10, %s536_s9  ;;  %p608_p1 = scmp.eq.s32.totalorder %s322_s15, 0 }
   0x9   : > { %p612_p2 = scmp.eq.s32.totalorder %s322_s15, 1  ;;  %p111_p3 = scmp.eq.s32.totalorder %s323_s16, 1 }
   0xa   : > { %p618_p4 = por %p608_p1, %p53_p0  ;;  %p324_p5 = scmp.ge.s32.totalorder %s556_s14, 1 }
   0xb   : > { %p623_p6 = por %p111_p3, %p53_p0  ;;  %p118_p7 = scmp.lt.s32.totalorder %s556_s14, 3 }
   0xc   : > { %s132_s23 = sshll.u32 %s724_s1, 4  ;;  %p326_p9 = scmp.ge.s32.totalorder %s556_s14, 2  ;;  %s133_s23 = int_to_ptr.hbm [resolvable:$true] %s132_s23 }
   0xd   : > { %p631_p8 = pnand %p324_p5, %p118_p7  ;;  %s558_s25 = smov [#allocation5]  }
   0xe   : > { %s134_s26 = sshll.u32 %s558_s25, 4  ;;  %s28_s27 = sadd.s32 1, %s552_s13  ;;  %s135_s26 = int_to_ptr.vmem [resolvable:$true] %s134_s26 }
   0xf   : > { %p345_p10 = pneg %p631_p8  ;;  %p29_p12 = scmp.ge.s32.totalorder %s28_s27, 2 }
  0x10   : > { %s40_s28 = sadd.s32 1, %s544_s11  ;;  %p47_p13 = scmp.ne.s32.totalorder %s544_s11, %s540_s10 }
  0x11   : > { %p346_p11 = pnand %p345_p10, %p608_p1  ;;  %p48_p0 = scmp.eq.s32.totalorder %s556_s14, 0 }
  0x12   : > { %s739_s27 = smov (%p29_p12, %s28_s27), 0  ;;  %p653_p5 = por %p612_p2, %p47_p13 }
  0x13   : > { %348 = dma.hbm_to_vmem [thread:$0]  (!%p346_p11), %s133_s23, 32, %s135_s26, [#allocation6]  }
  0x14   : > { %p647_p3 = por %p48_p0, %p47_p13  ;;  %s35_s3 = ssub.s32 %s552_s13, %s739_s27 }
  0x15   : > { %p358_p7 = scmp.lt.s32.totalorder %s556_s14, 2  ;;  %p38_p10 = scmp.eq.s32.totalorder %s35_s3, 0 }
  0x16   : > { %s145_s4 = sand.u32 1, %s544_s11   ;;  %s328_s7 = sshll.u32 %s552_s13, 1 }
  0x17   : > { %s327_s5 = sshll.u32 %s145_s4, 1  ;;  %s155_s16 = scalar_lea.hbm %s723_s0, %s328_s7 }
  0x18   : > { %s662_s6 = scalar_select %p38_p10, %s544_s11, %s40_s28  }
  0x19   : > { %s149_s21 = scalar_lea.vmem [#allocation2], %s327_s5  ;;  %s157_s18 = sshll.u32 %s155_s16, 4  ;;  %s158_s18 = int_to_ptr.hbm [resolvable:$true] %s157_s18 }
  0x1a   : > { %s159_s22 = sshll.u32 %s149_s21, 4  ;;  %p350_p2 = pnand %p358_p7, %p647_p3  ;;  %s160_s22 = int_to_ptr.vmem [resolvable:$true] %s159_s22 }
  0x1b   : > { %s146_s23 = scalar_lea.sflag [#allocation3], %s145_s4  ;;  %168 = sbr.rel (%p631_p8) target bundleno = 50 (0x32), region = 28 }
  0x1c   : > { %352 = dma.hbm_to_vmem [thread:$0]  (!%p350_p2), %s158_s18, 32, %s160_s22, %s146_s23  }
  0x1d   : > { %s673_s25 = sand.u32 (!%p631_p8), 1, %s540_s10  }
  0x1e   : > { %s330_s26 = sshll.u32 (!%p631_p8), %s673_s25, 1  ;;  %s171_s28 = scalar_lea.sflag (!%p631_p8), [#allocation3], %s673_s25 }
  0x1f   : > { %s174_s3 = scalar_lea.vmem (!%p631_p8), [#allocation2], %s330_s26 }
  0x20   : > { %523 = dma.done.wait (%p618_p4), %s171_s28, 32  }
  0x21   : > { %525 = vsyncadd (%p618_p4), %s171_s28, 4294967264 }
  0x22   : > { %527 = dma.done.wait (%p608_p1), [#allocation6], 32  }
  0x23   : > { %529 = vsyncadd (%p608_p1), [#allocation6], 4294967264  ;;  %s334_s24 = sshll.u32 %s548_s12, 1  ;;  %v205_v0 = vlaneseq  ;;  %v201_v1 = vld [vmem:[%s174_s3] sm:$0x3]  ;;  %s200_s7 = scalar_lea.vmem [#allocation7], %s330_s26 }
  0x24   : > { %s223_s5 = scalar_lea.hbm %s725_s2, %s334_s24  ;;  %v203_v2 = vld [vmem:[#allocation5] sm:$0x3]  ;;  %s225_s19 = sshll.u32 %s200_s7, 4  ;;  %v202_v3 = vmul.f32 5.656854, %v201_v1  ;;  %s226_s19 = int_to_ptr.vmem [resolvable:$true] %s225_s19 }
  0x25   : > { %s227_s8 = sshll.u32 %s223_s5, 4  ;;  %vm207_vm0 = vcmp.lt.s32.totalorder %v205_v0, 256  ;;  %s211_s17 = scalar_lea.sflag [#allocation4], %s673_s25  ;;  %s228_s8 = int_to_ptr.hbm [resolvable:$true] %s227_s8 }
  0x26   : > { %v204_v4 = vadd.f32 %v203_v2, %v202_v3  ;;  %s484_s15 = sshra.s32 %s228_s8, 4  ;;  %s490_s22 = scalar_lea.hbm %s725_s2, 4  ;;  %s485_s15 = int_to_ptr.hbm [resolvable:$true] %s484_s15 }
  0x27   : > { %s486_s12 = scalar_lea.hbm %s485_s15, 2  ;;  %p491_p11 = scmp.lt.s32.totalorder %s485_s15, %s725_s2 }
  0x28   : > { %209 = vst.msk [vmem:[%s200_s7] sm:$0x3] %vm207_vm0, %v204_v4  ;;  %p487_p1 = scmp.ne.s32.totalorder %s485_s15, %s486_s12  ;;  %p492_p12 = scmp.lt.s32.totalorder %s490_s22, %s486_s12 }
  0x2a   : > { %p488_p4 = pnand %p487_p1, %p653_p5  ;;  %p493_p13 = por %p492_p12, %p491_p11 }
  0x2c   : > { %p489_p8 = pneg %p488_p4 }
  0x2e   : > { %p494_p0 = pnand %p493_p13, %p489_p8 }
  0x30   : > { %497 = shalt.err (!%p494_p0)
}
  0x31   : > { %343 = dma.vmem_to_hbm [thread:$0]  (%p653_p5), %s226_s19, 32, %s228_s8, %s211_s17  }
  0x32 PF: > { %s239_s25 = sand.u32 1, %s536_s9   ;;  %p354_p3 = pnand %p326_p9, %p623_p6 }
  0x33   : > { %s240_s26 = scalar_lea.sflag [#allocation4], %s239_s25 }
  0x34   : > { %p355_p7 = pneg %p354_p3 }
  0x36   : > { %531 = dma.done.wait (%p355_p7), %s240_s26, 32  }
  0x37   : > { %533 = vsyncadd (%p355_p7), %s240_s26, 4294967264  ;;  %s19_s14 = sadd.s32 1, %s556_s14   ;;  %s733_s9 = smov %s540_s10 }
  0x38   : > { %p16_p10 = scmp.ge.s32.totalorder %s19_s14, 4   ;;  %s734_s10 = smov %s544_s11 }
  0x39   : > { %s735_s11 = smov %s662_s6  ;;  %s736_s12 = smov %s552_s13 }
  0x3a   : > { %s737_s13 = smov %s739_s27  ;;  %18 = sbr.rel (!%p16_p10) target bundleno = 7 (0x7), region = 78 }
  0x3f   :  { %246 = vsyncpa [#allocation3], 1 }
  0x40   :  { %248 = vsyncpa [#allocation3 + $0x1], 1 }
  0x41   :  { %249 = vsyncpa [#allocation6], 1 }
  0x42   :  { %250 = vsyncpa [#allocation4], 1 }
  0x43   :  { %252 = vsyncpa [#allocation4 + $0x1], 1 }

</bundles_post_ra>
